<compile_context>
chip_gen: v7x
topology: tpu7x:2x2x1
jax: 0.10.0
libtpu: 0.0.40
codegen_flags: <defaults>
</compile_context>

<pallas_src>
import jax
import jax.numpy as jnp
from jax.experimental import pallas as pl
from jax.experimental.pallas import tpu as pltpu

CSI_DIM = 128
N_CLASSES = 3
LAYER_DIMS = [CSI_DIM, 256, 64, 32, 16, 4, N_CLASSES]  # 6 Linear layers, 5 BN layers
BN_EPS = 1e-5
PAD = 128  # lane width every narrow layer is padded to

# ---- SLAB_MAIN (144, 256) float32 layout -----------------------------------
#   rows   0..127 : W1 (128 x 256)
#   row   128..130: b1, gamma1, beta1                     (width 256)
#   rows 131..142 : (b, gamma, beta) for layers 2..5, lanes [0, 128)
#   row   143     : b6, lanes [0, 128)
MAIN_ROWS = 144
MAIN_COLS = 256
VROW_B1 = 128
VROW_L2 = 131
VROW_B6 = 143

# ---- WREST (768, 128) bfloat16 layout (rows = input dim, padded) -----------
#   W2: rows [  0, 256)  (actual 256 x 64)
#   W3: rows [256, 384)  (actual  64 x 32)
#   W4: rows [384, 512)  (actual  32 x 16)
#   W5: rows [512, 640)  (actual  16 x  4)
#   W6: rows [640, 768)  (actual   4 x  3)
_WREST_ROWS = [256, 128, 128, 128, 128]
_WREST_OFFS = [0, 256, 384, 512, 640]
WREST_TOTAL_ROWS = 768


def my_nn_kernel(x_ref, main_ref, wrest_ref, o_ref):
    h = x_ref[...].astype(jnp.float32)                       # (B, 128)
    inv_b = jnp.float32(1.0 / h.shape[0])

    def relu_bn(h, g, beta):
        # ReLU -> training-mode BatchNorm1d, fused single pass over h (f32).
        h = jnp.maximum(h, 0.0)
        s1 = jnp.sum(h, axis=0, keepdims=True)
        s2 = jnp.sum(h * h, axis=0, keepdims=True)
        mean = s1 * inv_b
        var = jnp.maximum(s2 * inv_b - mean * mean, 0.0)      # biased batch var
        scale = g * jax.lax.rsqrt(var + BN_EPS)               # EUP rsqrt (free slot)
        shift = beta - mean * scale
        return h * scale + shift

    # ---- layer 1: 128 -> 256 (f32 weights, rows 0..127 of the main slab) ----
    w1 = main_ref[0:CSI_DIM, :]                               # (128, 256) f32
    h = jnp.dot(h, w1, preferred_element_type=jnp.float32) + main_ref[VROW_B1:VROW_B1 + 1, :]
    h = relu_bn(h, main_ref[VROW_B1 + 1:VROW_B1 + 2, :], main_ref[VROW_B1 + 2:VROW_B1 + 3, :])

    # ---- layers 2..5: Linear -> ReLU -> BN, bf16 weights, 128-lane padded ----
    for li in range(4):
        r0 = _WREST_OFFS[li]
        w = wrest_ref[r0:r0 + _WREST_ROWS[li], :]             # bf16 (K_pad, 128)
        vrow = VROW_L2 + 3 * li
        b = main_ref[vrow:vrow + 1, 0:PAD]
        g = main_ref[vrow + 1:vrow + 2, 0:PAD]
        be = main_ref[vrow + 2:vrow + 3, 0:PAD]
        h = jnp.dot(h.astype(jnp.bfloat16), w, preferred_element_type=jnp.float32) + b
        h = relu_bn(h, g, be)

    # ---- final classifier 4 -> 3 (padded to 128 lanes: lane-dense store) ----
    w6 = wrest_ref[_WREST_OFFS[4]:_WREST_OFFS[4] + _WREST_ROWS[4], :]
    b6 = main_ref[VROW_B6:VROW_B6 + 1, 0:PAD]
    o_ref[...] = (jnp.dot(h.astype(jnp.bfloat16), w6,
                          preferred_element_type=jnp.float32) + b6).astype(o_ref.dtype)


def my_nn_forward_grouped(x_groups, packed_params, *, return_padded=False):
    """x_groups: (G, B, 128) f32 — G independent batches, each BN-normalized on
    its own B rows.  Weights are DMA'd once and stay resident across the grid."""
    slab_main, wrest = packed_params
    G, B, F = x_groups.shape
    assert F == CSI_DIM

    flops = 2 * G * B * sum(LAYER_DIMS[i] * LAYER_DIMS[i + 1]
                            for i in range(len(LAYER_DIMS) - 1))
    transcendentals = G * sum(LAYER_DIMS[1:-1])               # one rsqrt per BN feature
    bytes_accessed = int(slab_main.size * 4 + wrest.size * 2
                         + G * B * (CSI_DIM + PAD) * 4)

    out = pl.pallas_call(
        my_nn_kernel,
        out_shape=jax.ShapeDtypeStruct((G, B, PAD), jnp.float32),
        grid_spec=pltpu.PrefetchScalarGridSpec(
            num_scalar_prefetch=0,
            grid=(G,),
            in_specs=[
                pl.BlockSpec((None, B, CSI_DIM), lambda g: (g, 0, 0)),    # x block
                pl.BlockSpec((MAIN_ROWS, MAIN_COLS), lambda g: (0, 0)),   # resident
                pl.BlockSpec((WREST_TOTAL_ROWS, PAD), lambda g: (0, 0)),  # resident
            ],
            out_specs=pl.BlockSpec((None, B, PAD), lambda g: (g, 0, 0)),
        ),
        compiler_params=pltpu.CompilerParams(
            dimension_semantics=("parallel",),                # shard groups across TCs
            vmem_limit_bytes=32 * 1024 * 1024,
        ),
        cost_estimate=pl.CostEstimate(
            flops=flops, transcendentals=transcendentals, bytes_accessed=bytes_accessed),
    )(x_groups, slab_main, wrest)

    if return_padded:
        return out                        # (G, B, 128), class lanes 0..2, pads exactly 0
    return out[..., :N_CLASSES]


def my_nn_forward(x, packed_params):
    """Single-batch module forward: x (B, 128) f32 -> (B, n_classes)."""
    return my_nn_forward_grouped(x[None], packed_params)[0]


def init_layer_params(key):
    """Per-layer (W(in,out), b(out,), gamma(out,)|None, beta(out,)|None).
    Kaiming-uniform-ish weights, zero biases, BN gamma=1 / beta=0."""
    layers = []
    n_linear = len(LAYER_DIMS) - 1
    keys = jax.random.split(key, n_linear)
    for i in range(n_linear):
        fan_in, fan_out = LAYER_DIMS[i], LAYER_DIMS[i + 1]
        bound = jnp.sqrt(6.0 / fan_in)
        w = jax.random.uniform(keys[i], (fan_in, fan_out), jnp.float32,
                               minval=-bound, maxval=bound)
        b = jnp.zeros((fan_out,), jnp.float32)
        if i < n_linear - 1:
            g = jnp.ones((fan_out,), jnp.float32)
            be = jnp.zeros((fan_out,), jnp.float32)
        else:
            g = be = None
        layers.append((w, b, g, be))
    return layers


def pack_params(layers):
    """Pack the 22 small parameter arrays into 2 DMA-friendly slabs."""
    main = jnp.zeros((MAIN_ROWS, MAIN_COLS), jnp.float32)
    w1, b1, g1, be1 = layers[0]
    main = main.at[0:CSI_DIM, :].set(w1)
    main = main.at[VROW_B1, :].set(b1)
    main = main.at[VROW_B1 + 1, :].set(g1)
    main = main.at[VROW_B1 + 2, :].set(be1)
    for li in range(1, 5):
        _, b, g, be = layers[li]
        f = b.shape[0]
        row = VROW_L2 + 3 * (li - 1)
        main = main.at[row, :f].set(b)
        main = main.at[row + 1, :f].set(g)
        main = main.at[row + 2, :f].set(be)
    main = main.at[VROW_B6, :N_CLASSES].set(layers[5][1])

    wrest = jnp.zeros((WREST_TOTAL_ROWS, PAD), jnp.float32)
    for li in range(1, 6):
        w = layers[li][0]
        r0 = _WREST_OFFS[li - 1]
        wrest = wrest.at[r0:r0 + w.shape[0], :w.shape[1]].set(w)
    wrest = wrest.astype(jnp.bfloat16)      # padded lanes/rows are exact bf16 zeros
    return main, wrest


def reference_forward(x, layers, mimic_kernel_precision=True):
    """Pure-JAX reference (PyTorch train-mode semantics, two-pass variance).
    With mimic_kernel_precision, layers 2..6 use the same bf16-rounded weights
    and bf16-cast activations the deployed kernel uses (f32 accumulation)."""
    h = x
    n = len(layers)
    for i, (w, b, g, be) in enumerate(layers):
        if mimic_kernel_precision and i >= 1:
            h = jnp.dot(h.astype(jnp.bfloat16), w.astype(jnp.bfloat16),
                        preferred_element_type=jnp.float32) + b[None, :]
        else:
            h = h @ w + b[None, :]
        if i < n - 1:
            h = jnp.maximum(h, 0.0)
            mean = jnp.mean(h, axis=0, keepdims=True)
            var = jnp.mean((h - mean) ** 2, axis=0, keepdims=True)
            h = (h - mean) * jax.lax.rsqrt(var + BN_EPS) * g[None, :] + be[None, :]
    return h


if __name__ == "__main__":
    key = jax.random.PRNGKey(0)
    k_x, k_xg, k_p = jax.random.split(key, 3)

    layers = init_layer_params(k_p)
    packed = pack_params(layers)

    # ---- single-batch module forward (grid of size 1) ----
    batch = 8
    x = jax.random.normal(k_x, (batch, CSI_DIM), jnp.float32)
    out = jax.block_until_ready(my_nn_forward(x, packed))
    ref = reference_forward(x, layers)
    assert out.shape == (batch, N_CLASSES)
    assert jnp.allclose(out, ref, atol=5e-4, rtol=5e-4), "mismatch vs reference"

    # ---- gridded path: G independent batch groups in one launch ----
    G = 4
    xg = jax.random.normal(k_xg, (G, batch, CSI_DIM), jnp.float32)
    outg = jax.block_until_ready(my_nn_forward_grouped(xg, packed))
    assert outg.shape == (G, batch, N_CLASSES)
    for gi in range(G):
        refg = reference_forward(xg[gi], layers)
        assert jnp.allclose(outg[gi], refg, atol=5e-4, rtol=5e-4), "grouped mismatch"

    print("KERNEL_OK")
</pallas_src>

<mosaic_0001>
module attributes {stable_mosaic.version = 11 : i64} {
  func.func @my_nn_kernel(%arg0: i32, %arg1: memref<1x8x128xf32, #tpu.memory_space<vmem>>, %arg2: memref<144x256xf32, #tpu.memory_space<vmem>>, %arg3: memref<768x128xbf16, #tpu.memory_space<vmem>>, %arg4: memref<1x8x128xf32, #tpu.memory_space<vmem>>) attributes {dimension_semantics = [#tpu.dimension_semantics<parallel>], iteration_bounds = array<i64: 1>, scalar_prefetch = 0 : i64, scratch_operands = 0 : i64, tpu.core_type = #tpu.core_type<tc>, window_params = [{transform_indices = @transform_0, window_bounds = array<i64: 1, 8, 128>}, {pipeline_mode = #tpu.pipeline_mode<synchronous>, transform_indices = @transform_1, window_bounds = array<i64: 144, 256>}, {pipeline_mode = #tpu.pipeline_mode<synchronous>, transform_indices = @transform_2, window_bounds = array<i64: 768, 128>}, {transform_indices = @transform_3, window_bounds = array<i64: 1, 8, 128>}]} {
    %c0 = arith.constant 0 : index
    %c0_0 = arith.constant 0 : index
    %c0_1 = arith.constant 0 : index
    %0 = vector.load %arg1[%c0, %c0_0, %c0_1] : memref<1x8x128xf32, #tpu.memory_space<vmem>>, vector<1x8x128xf32>
    %1 = vector.shape_cast %0 : vector<1x8x128xf32> to vector<8x128xf32>
    %c0_2 = arith.constant 0 : index
    %c0_3 = arith.constant 0 : index
    %2 = vector.load %arg2[%c0_2, %c0_3] : memref<144x256xf32, #tpu.memory_space<vmem>>, vector<128x256xf32>
    %cst = arith.constant dense<0.000000e+00> : vector<8x256xf32>
    %3 = tpu.matmul %1, %2, %cst {dimension_numbers = #tpu.dot_dimension_numbers<[1], [0], [0], [1], [0, 0, 1, 1], [], []>} : vector<8x128xf32>, vector<128x256xf32>, vector<8x256xf32> -> vector<8x256xf32>
    %c128 = arith.constant 128 : index
    %c0_4 = arith.constant 0 : index
    %4 = vector.load %arg2[%c128, %c0_4] : memref<144x256xf32, #tpu.memory_space<vmem>>, vector<1x256xf32>
    %5 = vector.broadcast %4 : vector<1x256xf32> to vector<8x256xf32>
    %6 = arith.addf %3, %5 : vector<8x256xf32>
    %c129 = arith.constant 129 : index
    %c0_5 = arith.constant 0 : index
    %7 = vector.load %arg2[%c129, %c0_5] : memref<144x256xf32, #tpu.memory_space<vmem>>, vector<1x256xf32>
    %c130 = arith.constant 130 : index
    %c0_6 = arith.constant 0 : index
    %8 = vector.load %arg2[%c130, %c0_6] : memref<144x256xf32, #tpu.memory_space<vmem>>, vector<1x256xf32>
    %cst_7 = arith.constant 0.000000e+00 : f32
    %9 = vector.broadcast %cst_7 : f32 to vector<8x256xf32>
    %10 = arith.maximumf %6, %9 : vector<8x256xf32>
    %cst_8 = arith.constant dense<0.000000e+00> : vector<256xf32>
    %11 = vector.multi_reduction <add>, %10, %cst_8 [0] : vector<8x256xf32> to vector<256xf32>
    %12 = vector.shape_cast %11 : vector<256xf32> to vector<1x256xf32>
    %13 = arith.mulf %10, %10 : vector<8x256xf32>
    %cst_9 = arith.constant dense<0.000000e+00> : vector<256xf32>
    %14 = vector.multi_reduction <add>, %13, %cst_9 [0] : vector<8x256xf32> to vector<256xf32>
    %15 = vector.shape_cast %14 : vector<256xf32> to vector<1x256xf32>
    %cst_10 = arith.constant 1.250000e-01 : f32
    %16 = vector.broadcast %cst_10 : f32 to vector<1x256xf32>
    %17 = arith.mulf %12, %16 : vector<1x256xf32>
    %cst_11 = arith.constant 1.250000e-01 : f32
    %18 = vector.broadcast %cst_11 : f32 to vector<1x256xf32>
    %19 = arith.mulf %15, %18 : vector<1x256xf32>
    %20 = arith.mulf %17, %17 : vector<1x256xf32>
    %21 = arith.subf %19, %20 : vector<1x256xf32>
    %cst_12 = arith.constant 0.000000e+00 : f32
    %22 = vector.broadcast %cst_12 : f32 to vector<1x256xf32>
    %23 = arith.maximumf %21, %22 : vector<1x256xf32>
    %cst_13 = arith.constant 9.99999974E-6 : f32
    %24 = vector.broadcast %cst_13 : f32 to vector<1x256xf32>
    %25 = arith.addf %23, %24 : vector<1x256xf32>
    %26 = math.rsqrt %25 : vector<1x256xf32>
    %27 = arith.mulf %7, %26 : vector<1x256xf32>
    %28 = arith.mulf %17, %27 : vector<1x256xf32>
    %29 = arith.subf %8, %28 : vector<1x256xf32>
    %30 = vector.broadcast %27 : vector<1x256xf32> to vector<8x256xf32>
    %31 = arith.mulf %10, %30 : vector<8x256xf32>
    %32 = vector.broadcast %29 : vector<1x256xf32> to vector<8x256xf32>
    %33 = arith.addf %31, %32 : vector<8x256xf32>
    %c0_14 = arith.constant 0 : index
    %c0_15 = arith.constant 0 : index
    %34 = vector.load %arg3[%c0_14, %c0_15] : memref<768x128xbf16, #tpu.memory_space<vmem>>, vector<256x128xbf16>
    %c131 = arith.constant 131 : index
    %c0_16 = arith.constant 0 : index
    %35 = vector.load %arg2[%c131, %c0_16] : memref<144x256xf32, #tpu.memory_space<vmem>>, vector<1x128xf32>
    %c132 = arith.constant 132 : index
    %c0_17 = arith.constant 0 : index
    %36 = vector.load %arg2[%c132, %c0_17] : memref<144x256xf32, #tpu.memory_space<vmem>>, vector<1x128xf32>
    %c133 = arith.constant 133 : index
    %c0_18 = arith.constant 0 : index
    %37 = vector.load %arg2[%c133, %c0_18] : memref<144x256xf32, #tpu.memory_space<vmem>>, vector<1x128xf32>
    %38 = arith.truncf %33 : vector<8x256xf32> to vector<8x256xbf16>
    %cst_19 = arith.constant dense<0.000000e+00> : vector<8x128xf32>
    %39 = tpu.matmul %38, %34, %cst_19 {dimension_numbers = #tpu.dot_dimension_numbers<[1], [0], [0], [1], [0, 0, 1, 1], [], []>} : vector<8x256xbf16>, vector<256x128xbf16>, vector<8x128xf32> -> vector<8x128xf32>
    %40 = vector.broadcast %35 : vector<1x128xf32> to vector<8x128xf32>
    %41 = arith.addf %39, %40 : vector<8x128xf32>
    %cst_20 = arith.constant 0.000000e+00 : f32
    %42 = vector.broadcast %cst_20 : f32 to vector<8x128xf32>
    %43 = arith.maximumf %41, %42 : vector<8x128xf32>
    %cst_21 = arith.constant dense<0.000000e+00> : vector<128xf32>
    %44 = vector.multi_reduction <add>, %43, %cst_21 [0] : vector<8x128xf32> to vector<128xf32>
    %45 = vector.shape_cast %44 : vector<128xf32> to vector<1x128xf32>
    %46 = arith.mulf %43, %43 : vector<8x128xf32>
    %cst_22 = arith.constant dense<0.000000e+00> : vector<128xf32>
    %47 = vector.multi_reduction <add>, %46, %cst_22 [0] : vector<8x128xf32> to vector<128xf32>
    %48 = vector.shape_cast %47 : vector<128xf32> to vector<1x128xf32>
    %cst_23 = arith.constant 1.250000e-01 : f32
    %49 = vector.broadcast %cst_23 : f32 to vector<1x128xf32>
    %50 = arith.mulf %45, %49 : vector<1x128xf32>
    %cst_24 = arith.constant 1.250000e-01 : f32
    %51 = vector.broadcast %cst_24 : f32 to vector<1x128xf32>
    %52 = arith.mulf %48, %51 : vector<1x128xf32>
    %53 = arith.mulf %50, %50 : vector<1x128xf32>
    %54 = arith.subf %52, %53 : vector<1x128xf32>
    %cst_25 = arith.constant 0.000000e+00 : f32
    %55 = vector.broadcast %cst_25 : f32 to vector<1x128xf32>
    %56 = arith.maximumf %54, %55 : vector<1x128xf32>
    %cst_26 = arith.constant 9.99999974E-6 : f32
    %57 = vector.broadcast %cst_26 : f32 to vector<1x128xf32>
    %58 = arith.addf %56, %57 : vector<1x128xf32>
    %59 = math.rsqrt %58 : vector<1x128xf32>
    %60 = arith.mulf %36, %59 : vector<1x128xf32>
    %61 = arith.mulf %50, %60 : vector<1x128xf32>
    %62 = arith.subf %37, %61 : vector<1x128xf32>
    %63 = vector.broadcast %60 : vector<1x128xf32> to vector<8x128xf32>
    %64 = arith.mulf %43, %63 : vector<8x128xf32>
    %65 = vector.broadcast %62 : vector<1x128xf32> to vector<8x128xf32>
    %66 = arith.addf %64, %65 : vector<8x128xf32>
    %c256 = arith.constant 256 : index
    %c0_27 = arith.constant 0 : index
    %67 = vector.load %arg3[%c256, %c0_27] : memref<768x128xbf16, #tpu.memory_space<vmem>>, vector<128x128xbf16>
    %c134 = arith.constant 134 : index
    %c0_28 = arith.constant 0 : index
    %68 = vector.load %arg2[%c134, %c0_28] : memref<144x256xf32, #tpu.memory_space<vmem>>, vector<1x128xf32>
    %c135 = arith.constant 135 : index
    %c0_29 = arith.constant 0 : index
    %69 = vector.load %arg2[%c135, %c0_29] : memref<144x256xf32, #tpu.memory_space<vmem>>, vector<1x128xf32>
    %c136 = arith.constant 136 : index
    %c0_30 = arith.constant 0 : index
    %70 = vector.load %arg2[%c136, %c0_30] : memref<144x256xf32, #tpu.memory_space<vmem>>, vector<1x128xf32>
    %71 = arith.truncf %66 : vector<8x128xf32> to vector<8x128xbf16>
    %cst_31 = arith.constant dense<0.000000e+00> : vector<8x128xf32>
    %72 = tpu.matmul %71, %67, %cst_31 {dimension_numbers = #tpu.dot_dimension_numbers<[1], [0], [0], [1], [0, 0, 1, 1], [], []>} : vector<8x128xbf16>, vector<128x128xbf16>, vector<8x128xf32> -> vector<8x128xf32>
    %73 = vector.broadcast %68 : vector<1x128xf32> to vector<8x128xf32>
    %74 = arith.addf %72, %73 : vector<8x128xf32>
    %cst_32 = arith.constant 0.000000e+00 : f32
    %75 = vector.broadcast %cst_32 : f32 to vector<8x128xf32>
    %76 = arith.maximumf %74, %75 : vector<8x128xf32>
    %cst_33 = arith.constant dense<0.000000e+00> : vector<128xf32>
    %77 = vector.multi_reduction <add>, %76, %cst_33 [0] : vector<8x128xf32> to vector<128xf32>
    %78 = vector.shape_cast %77 : vector<128xf32> to vector<1x128xf32>
    %79 = arith.mulf %76, %76 : vector<8x128xf32>
    %cst_34 = arith.constant dense<0.000000e+00> : vector<128xf32>
    %80 = vector.multi_reduction <add>, %79, %cst_34 [0] : vector<8x128xf32> to vector<128xf32>
    %81 = vector.shape_cast %80 : vector<128xf32> to vector<1x128xf32>
    %cst_35 = arith.constant 1.250000e-01 : f32
    %82 = vector.broadcast %cst_35 : f32 to vector<1x128xf32>
    %83 = arith.mulf %78, %82 : vector<1x128xf32>
    %cst_36 = arith.constant 1.250000e-01 : f32
    %84 = vector.broadcast %cst_36 : f32 to vector<1x128xf32>
    %85 = arith.mulf %81, %84 : vector<1x128xf32>
    %86 = arith.mulf %83, %83 : vector<1x128xf32>
    %87 = arith.subf %85, %86 : vector<1x128xf32>
    %cst_37 = arith.constant 0.000000e+00 : f32
    %88 = vector.broadcast %cst_37 : f32 to vector<1x128xf32>
    %89 = arith.maximumf %87, %88 : vector<1x128xf32>
    %cst_38 = arith.constant 9.99999974E-6 : f32
    %90 = vector.broadcast %cst_38 : f32 to vector<1x128xf32>
    %91 = arith.addf %89, %90 : vector<1x128xf32>
    %92 = math.rsqrt %91 : vector<1x128xf32>
    %93 = arith.mulf %69, %92 : vector<1x128xf32>
    %94 = arith.mulf %83, %93 : vector<1x128xf32>
    %95 = arith.subf %70, %94 : vector<1x128xf32>
    %96 = vector.broadcast %93 : vector<1x128xf32> to vector<8x128xf32>
    %97 = arith.mulf %76, %96 : vector<8x128xf32>
    %98 = vector.broadcast %95 : vector<1x128xf32> to vector<8x128xf32>
    %99 = arith.addf %97, %98 : vector<8x128xf32>
    %c384 = arith.constant 384 : index
    %c0_39 = arith.constant 0 : index
    %100 = vector.load %arg3[%c384, %c0_39] : memref<768x128xbf16, #tpu.memory_space<vmem>>, vector<128x128xbf16>
    %c137 = arith.constant 137 : index
    %c0_40 = arith.constant 0 : index
    %101 = vector.load %arg2[%c137, %c0_40] : memref<144x256xf32, #tpu.memory_space<vmem>>, vector<1x128xf32>
    %c138 = arith.constant 138 : index
    %c0_41 = arith.constant 0 : index
    %102 = vector.load %arg2[%c138, %c0_41] : memref<144x256xf32, #tpu.memory_space<vmem>>, vector<1x128xf32>
    %c139 = arith.constant 139 : index
    %c0_42 = arith.constant 0 : index
    %103 = vector.load %arg2[%c139, %c0_42] : memref<144x256xf32, #tpu.memory_space<vmem>>, vector<1x128xf32>
    %104 = arith.truncf %99 : vector<8x128xf32> to vector<8x128xbf16>
    %cst_43 = arith.constant dense<0.000000e+00> : vector<8x128xf32>
    %105 = tpu.matmul %104, %100, %cst_43 {dimension_numbers = #tpu.dot_dimension_numbers<[1], [0], [0], [1], [0, 0, 1, 1], [], []>} : vector<8x128xbf16>, vector<128x128xbf16>, vector<8x128xf32> -> vector<8x128xf32>
    %106 = vector.broadcast %101 : vector<1x128xf32> to vector<8x128xf32>
    %107 = arith.addf %105, %106 : vector<8x128xf32>
    %cst_44 = arith.constant 0.000000e+00 : f32
    %108 = vector.broadcast %cst_44 : f32 to vector<8x128xf32>
    %109 = arith.maximumf %107, %108 : vector<8x128xf32>
    %cst_45 = arith.constant dense<0.000000e+00> : vector<128xf32>
    %110 = vector.multi_reduction <add>, %109, %cst_45 [0] : vector<8x128xf32> to vector<128xf32>
    %111 = vector.shape_cast %110 : vector<128xf32> to vector<1x128xf32>
    %112 = arith.mulf %109, %109 : vector<8x128xf32>
    %cst_46 = arith.constant dense<0.000000e+00> : vector<128xf32>
    %113 = vector.multi_reduction <add>, %112, %cst_46 [0] : vector<8x128xf32> to vector<128xf32>
    %114 = vector.shape_cast %113 : vector<128xf32> to vector<1x128xf32>
    %cst_47 = arith.constant 1.250000e-01 : f32
    %115 = vector.broadcast %cst_47 : f32 to vector<1x128xf32>
    %116 = arith.mulf %111, %115 : vector<1x128xf32>
    %cst_48 = arith.constant 1.250000e-01 : f32
    %117 = vector.broadcast %cst_48 : f32 to vector<1x128xf32>
    %118 = arith.mulf %114, %117 : vector<1x128xf32>
    %119 = arith.mulf %116, %116 : vector<1x128xf32>
    %120 = arith.subf %118, %119 : vector<1x128xf32>
    %cst_49 = arith.constant 0.000000e+00 : f32
    %121 = vector.broadcast %cst_49 : f32 to vector<1x128xf32>
    %122 = arith.maximumf %120, %121 : vector<1x128xf32>
    %cst_50 = arith.constant 9.99999974E-6 : f32
    %123 = vector.broadcast %cst_50 : f32 to vector<1x128xf32>
    %124 = arith.addf %122, %123 : vector<1x128xf32>
    %125 = math.rsqrt %124 : vector<1x128xf32>
    %126 = arith.mulf %102, %125 : vector<1x128xf32>
    %127 = arith.mulf %116, %126 : vector<1x128xf32>
    %128 = arith.subf %103, %127 : vector<1x128xf32>
    %129 = vector.broadcast %126 : vector<1x128xf32> to vector<8x128xf32>
    %130 = arith.mulf %109, %129 : vector<8x128xf32>
    %131 = vector.broadcast %128 : vector<1x128xf32> to vector<8x128xf32>
    %132 = arith.addf %130, %131 : vector<8x128xf32>
    %c512 = arith.constant 512 : index
    %c0_51 = arith.constant 0 : index
    %133 = vector.load %arg3[%c512, %c0_51] : memref<768x128xbf16, #tpu.memory_space<vmem>>, vector<128x128xbf16>
    %c140 = arith.constant 140 : index
    %c0_52 = arith.constant 0 : index
    %134 = vector.load %arg2[%c140, %c0_52] : memref<144x256xf32, #tpu.memory_space<vmem>>, vector<1x128xf32>
    %c141 = arith.constant 141 : index
    %c0_53 = arith.constant 0 : index
    %135 = vector.load %arg2[%c141, %c0_53] : memref<144x256xf32, #tpu.memory_space<vmem>>, vector<1x128xf32>
    %c142 = arith.constant 142 : index
    %c0_54 = arith.constant 0 : index
    %136 = vector.load %arg2[%c142, %c0_54] : memref<144x256xf32, #tpu.memory_space<vmem>>, vector<1x128xf32>
    %137 = arith.truncf %132 : vector<8x128xf32> to vector<8x128xbf16>
    %cst_55 = arith.constant dense<0.000000e+00> : vector<8x128xf32>
    %138 = tpu.matmul %137, %133, %cst_55 {dimension_numbers = #tpu.dot_dimension_numbers<[1], [0], [0], [1], [0, 0, 1, 1], [], []>} : vector<8x128xbf16>, vector<128x128xbf16>, vector<8x128xf32> -> vector<8x128xf32>
    %139 = vector.broadcast %134 : vector<1x128xf32> to vector<8x128xf32>
    %140 = arith.addf %138, %139 : vector<8x128xf32>
    %cst_56 = arith.constant 0.000000e+00 : f32
    %141 = vector.broadcast %cst_56 : f32 to vector<8x128xf32>
    %142 = arith.maximumf %140, %141 : vector<8x128xf32>
    %cst_57 = arith.constant dense<0.000000e+00> : vector<128xf32>
    %143 = vector.multi_reduction <add>, %142, %cst_57 [0] : vector<8x128xf32> to vector<128xf32>
    %144 = vector.shape_cast %143 : vector<128xf32> to vector<1x128xf32>
    %145 = arith.mulf %142, %142 : vector<8x128xf32>
    %cst_58 = arith.constant dense<0.000000e+00> : vector<128xf32>
    %146 = vector.multi_reduction <add>, %145, %cst_58 [0] : vector<8x128xf32> to vector<128xf32>
    %147 = vector.shape_cast %146 : vector<128xf32> to vector<1x128xf32>
    %cst_59 = arith.constant 1.250000e-01 : f32
    %148 = vector.broadcast %cst_59 : f32 to vector<1x128xf32>
    %149 = arith.mulf %144, %148 : vector<1x128xf32>
    %cst_60 = arith.constant 1.250000e-01 : f32
    %150 = vector.broadcast %cst_60 : f32 to vector<1x128xf32>
    %151 = arith.mulf %147, %150 : vector<1x128xf32>
    %152 = arith.mulf %149, %149 : vector<1x128xf32>
    %153 = arith.subf %151, %152 : vector<1x128xf32>
    %cst_61 = arith.constant 0.000000e+00 : f32
    %154 = vector.broadcast %cst_61 : f32 to vector<1x128xf32>
    %155 = arith.maximumf %153, %154 : vector<1x128xf32>
    %cst_62 = arith.constant 9.99999974E-6 : f32
    %156 = vector.broadcast %cst_62 : f32 to vector<1x128xf32>
    %157 = arith.addf %155, %156 : vector<1x128xf32>
    %158 = math.rsqrt %157 : vector<1x128xf32>
    %159 = arith.mulf %135, %158 : vector<1x128xf32>
    %160 = arith.mulf %149, %159 : vector<1x128xf32>
    %161 = arith.subf %136, %160 : vector<1x128xf32>
    %162 = vector.broadcast %159 : vector<1x128xf32> to vector<8x128xf32>
    %163 = arith.mulf %142, %162 : vector<8x128xf32>
    %164 = vector.broadcast %161 : vector<1x128xf32> to vector<8x128xf32>
    %165 = arith.addf %163, %164 : vector<8x128xf32>
    %c640 = arith.constant 640 : index
    %c0_63 = arith.constant 0 : index
    %166 = vector.load %arg3[%c640, %c0_63] : memref<768x128xbf16, #tpu.memory_space<vmem>>, vector<128x128xbf16>
    %c143 = arith.constant 143 : index
    %c0_64 = arith.constant 0 : index
    %167 = vector.load %arg2[%c143, %c0_64] : memref<144x256xf32, #tpu.memory_space<vmem>>, vector<1x128xf32>
    %168 = arith.truncf %165 : vector<8x128xf32> to vector<8x128xbf16>
    %cst_65 = arith.constant dense<0.000000e+00> : vector<8x128xf32>
    %169 = tpu.matmul %168, %166, %cst_65 {dimension_numbers = #tpu.dot_dimension_numbers<[1], [0], [0], [1], [0, 0, 1, 1], [], []>} : vector<8x128xbf16>, vector<128x128xbf16>, vector<8x128xf32> -> vector<8x128xf32>
    %170 = vector.broadcast %167 : vector<1x128xf32> to vector<8x128xf32>
    %171 = arith.addf %169, %170 : vector<8x128xf32>
    %c0_66 = arith.constant 0 : index
    %c0_67 = arith.constant 0 : index
    %c0_68 = arith.constant 0 : index
    %172 = vector.load %arg4[%c0_66, %c0_67, %c0_68] : memref<1x8x128xf32, #tpu.memory_space<vmem>>, vector<1x8x128xf32>
    %173 = vector.shape_cast %172 : vector<1x8x128xf32> to vector<8x128xf32>
    %174 = vector.shape_cast %171 : vector<8x128xf32> to vector<1x8x128xf32>
    tpu.vector_store %arg4[%c0_66, %c0_67, %c0_68], %174 {strides = array<i32>} : memref<1x8x128xf32, #tpu.memory_space<vmem>>, vector<1x8x128xf32>,
    return
  }
  func.func @transform_0(%arg0: i32) -> (i32, i32, i32) {
    %c0_i32 = arith.constant 0 : i32
    %c0_i32_0 = arith.constant 0 : i32
    %c0_i32_1 = arith.constant 0 : i32
    return %arg0, %c0_i32, %c0_i32_0 : i32, i32, i32
  }
  func.func @transform_1(%arg0: i32) -> (i32, i32) {
    %c0_i32 = arith.constant 0 : i32
    %c0_i32_0 = arith.constant 0 : i32
    %c0_i32_1 = arith.constant 0 : i32
    return %c0_i32, %c0_i32_0 : i32, i32
  }
  func.func @transform_2(%arg0: i32) -> (i32, i32) {
    %c0_i32 = arith.constant 0 : i32
    %c0_i32_0 = arith.constant 0 : i32
    %c0_i32_1 = arith.constant 0 : i32
    return %c0_i32, %c0_i32_0 : i32, i32
  }
  func.func @transform_3(%arg0: i32) -> (i32, i32, i32) {
    %c0_i32 = arith.constant 0 : i32
    %c0_i32_0 = arith.constant 0 : i32
    %c0_i32_1 = arith.constant 0 : i32
    return %arg0, %c0_i32, %c0_i32_0 : i32, i32, i32
  }
}

</mosaic_0001>

<bundles_post_ra>
// kernel: tpu_custom_call.1
= control target key start
LH: loop header
LB: loop body
LE: loop exit
PB: predicated region body
PF: predicated region fallthrough
CT: control target
= control target key end

     0   :  { %8 = vsyncpa [#allocation3], 0  ;;  %s1521_s0 = inlined_call_operand.hbm [shape: f32[1,8,128], index: 0, kind: input, shape index: {}]   ;;  %s1522_s1 = inlined_call_operand.hbm [shape: f32[144,256], index: 1, kind: input, shape index: {}]   ;;  %s1523_s2 = inlined_call_operand.hbm [shape: bf16[768,128], index: 2, kind: input, shape index: {}]   ;;  %s1524_s3 = inlined_call_operand.hbm [shape: f32[1,8,128], index: 3, kind: output, shape index: {}]  }
   0x1   :  { %9 = vsyncpa [#allocation6], 0 }
   0x2   :  { %10 = vsyncpa [#allocation4], 0  ;;  %s1391_s12 = smov [#allocation5]   ;;  %s1297_s16 = scalar_lea.hbm %s1522_s1, 4608 }
   0x3   :  { %s26_s13 = sshll.u32 %s1391_s12, 4  ;;  %p1298_p0 = scmp.ne.s32.totalorder %s1522_s1, %s1297_s16  ;;  %s27_s13 = int_to_ptr.vmem [resolvable:$true] %s26_s13 }
   0x4   :  { %p1301_p1 = scmp.lt.u32.totalorder %s1297_s16, %s1522_s1 }
   0x6   :  { %p1303_p2 = pnand %p1301_p1, %p1298_p0 }
   0x8   :  { %1306 = shalt.err (!%p1303_p2)
}
   0x9   :  { %s1307_s21 = scalar_lea.vmem %s27_s13, 4608  ;;  %p1312_p4 = scmp.lt.s32.totalorder %s27_s13, %s27_s13 }
   0xa   :  { %p1308_p3 = scmp.ne.s32.totalorder %s27_s13, %s1307_s21  ;;  %p1313_p5 = scmp.lt.s32.totalorder %s1307_s21, %s1307_s21 }
   0xc   :  { %p1314_p6 = por %p1313_p5, %p1312_p4 }
   0xe   :  { %p1315_p7 = pnand %p1314_p6, %p1308_p3 }
  0x10   :  { %1318 = shalt.err (!%p1315_p7)
}
  0x11   :  { %s1392_s22 = smov 256   ;;  %s1393_s23 = smov 16  }
  0x12   :  { %32 = dma.hbm_to_vmem [thread:$0]  %s1522_s1, 4608, %s27_s13, [#allocation6], %s1392_s22, %s1392_s22, %s1393_s23  }
  0x13   :  { %s1394_s26 = smov [#allocation2]   ;;  %s1395_s28 = smov [#allocation7]  }
  0x14   :  { %s17_s27 = sshll.u32 %s1394_s26, 4  ;;  %s38_s29 = sshll.u32 %s1395_s28, 4  ;;  %s18_s27 = int_to_ptr.vmem [resolvable:$true] %s17_s27  ;;  %s39_s29 = int_to_ptr.vmem [resolvable:$true] %s38_s29 }
  0x15   :  { %s1319_s5 = scalar_lea.hbm %s1521_s0, 128 }
  0x16   :  { %p1320_p8 = scmp.ne.s32.totalorder %s1521_s0, %s1319_s5  ;;  %p1323_p9 = scmp.lt.u32.totalorder %s1319_s5, %s1521_s0 }
  0x18   :  { %p1325_p10 = pnand %p1323_p9, %p1320_p8 }
  0x1a   :  { %1328 = shalt.err (!%p1325_p10)
}
  0x1b   :  { %s1329_s1 = scalar_lea.vmem %s18_s27, 128  ;;  %p1334_p12 = scmp.lt.s32.totalorder %s18_s27, %s18_s27 }
  0x1c   :  { %p1330_p11 = scmp.ne.s32.totalorder %s18_s27, %s1329_s1  ;;  %p1335_p13 = scmp.lt.s32.totalorder %s1329_s1, %s1329_s1 }
  0x1e   :  { %p1336_p0 = por %p1335_p13, %p1334_p12 }
  0x20   :  { %p1337_p1 = pnand %p1336_p0, %p1330_p11 }
  0x22   :  { %1340 = shalt.err (!%p1337_p1)
}
  0x23   :  { %20 = dma.hbm_to_vmem [thread:$0]  %s1521_s0, 128, %s18_s27, [#allocation3]  }
  0x24   :  { %s1341_s14 = scalar_lea.hbm %s1523_s2, 6144 }
  0x25   :  { %p1342_p2 = scmp.ne.s32.totalorder %s1523_s2, %s1341_s14  ;;  %p1345_p3 = scmp.lt.u32.totalorder %s1341_s14, %s1523_s2 }
  0x27   :  { %p1347_p4 = pnand %p1345_p3, %p1342_p2 }
  0x29   :  { %1350 = shalt.err (!%p1347_p4)
}
  0x2a   :  { %s1351_s19 = scalar_lea.vmem %s39_s29, 6144  ;;  %p1356_p6 = scmp.lt.s32.totalorder %s39_s29, %s39_s29 }
  0x2b   :  { %p1352_p5 = scmp.ne.s32.totalorder %s39_s29, %s1351_s19  ;;  %p1357_p7 = scmp.lt.s32.totalorder %s1351_s19, %s1351_s19 }
  0x2d   :  { %p1358_p8 = por %p1357_p7, %p1356_p6 }
  0x2f   :  { %p1359_p9 = pnand %p1358_p8, %p1352_p5 }
  0x31   :  { %1362 = shalt.err (!%p1359_p9)
}
  0x32   :  { %s1396_s0 = smov 64   ;;  %s1397_s20 = smov 4  }
  0x33   :  { %44 = dma.hbm_to_vmem [thread:$0]  %s1523_s2, 6144, %s39_s29, [#allocation6], %s1396_s0, %s1396_s0, %s1397_s20  }
  0x34   :  { %1385 = dma.done.wait [#allocation3], 128  }
  0x35   :  { %1386 = vsyncadd [#allocation3], 4294967168 }
  0x36   :  { %1387 = dma.done.wait [#allocation6], 10752  }
  0x37   :  { %1388 = vsyncadd [#allocation6], 4294956544  ;;  %v1398_v0 = vmov 0.0   ;;  %v57_v1 = vld [vmem:[#allocation5 + $0x8] sm:$0xff]  ;;  %v59_v2 = vld [vmem:[#allocation5 + $0x18] sm:$0xff]  ;;  %vm1400_vm0 = vmmov 0  }
  0x38   :  { %165 = vmatprep.mubr.f32.mxu0 %v1398_v0  ;;  %v56_v3 = vld [vmem:[#allocation5] sm:$0xff]  ;;  %v1194_v4 = vpack.c.bf16 %v59_v2, %v57_v1  ;;  %v58_v5 = vld [vmem:[#allocation5 + $0x10] sm:$0xff]  ;;  %v61_v6 = vld [vmem:[#allocation5 + $0x28] sm:$0xff]  ;;  %s1401_s2 = smov [#allocation8]  }
  0x39   :  { %v63_v7 = vld [vmem:[#allocation5 + $0x38] sm:$0xff]  ;;  %v1196_v8 = vpack.c.bf16 %v58_v5, %v56_v3  ;;  %v60_v10 = vld [vmem:[#allocation5 + $0x20] sm:$0xff]  ;;  %v62_v11 = vld [vmem:[#allocation5 + $0x30] sm:$0xff]  ;;  %v91_v3 = vlaneseq  ;;  %s998_s23 = sshll.u32 %s1401_s2, 4  ;;  %s999_s23 = int_to_ptr.vmem [resolvable:$true] %s998_s23 }
  0x3a   :  { %v1198_v9 = vpack.c.bf16 %v63_v7, %v61_v6  ;;  %v65_v12 = vld [vmem:[#allocation5 + $0x48] sm:$0xff]  ;;  %1195 = vmatprep.subr.bf16.mxu0 %v1194_v4  ;;  %v67_v13 = vld [vmem:[#allocation5 + $0x58] sm:$0xff]  ;;  %v1200_v14 = vpack.c.bf16 %v62_v11, %v60_v10  ;;  %v64_v16 = vld [vmem:[#allocation5 + $0x40] sm:$0xff]  ;;  %s1363_s24 = scalar_lea.vmem %s999_s23, 128  ;;  %p1368_p11 = scmp.lt.s32.totalorder %s999_s23, %s999_s23 }
  0x3b   :  { %1197 = vmatpush1.bf16.msra.mxu0 %v1196_v8  ;;  %v1202_v15 = vpack.c.bf16 %v67_v13, %v65_v12  ;;  %v66_v17 = vld [vmem:[#allocation5 + $0x50] sm:$0xff]  ;;  %v69_v18 = vld [vmem:[#allocation5 + $0x68] sm:$0xff]  ;;  %v71_v19 = vld [vmem:[#allocation5 + $0x78] sm:$0xff]  ;;  %v92_v4 = vshrl.u32 %v91_v3, 7  ;;  %p1364_p10 = scmp.ne.s32.totalorder %s999_s23, %s1363_s24  ;;  %p1369_p12 = scmp.lt.s32.totalorder %s1363_s24, %s1363_s24 }
  0x3c   :  { %1199 = vmatprep.subr.bf16.mxu0 %v1198_v9  ;;  %v1204_v20 = vpack.c.bf16 %v66_v17, %v64_v16  ;;  %v1206_v21 = vpack.c.bf16 %v71_v19, %v69_v18  ;;  %v68_v22 = vld [vmem:[#allocation5 + $0x60] sm:$0xff]  ;;  %v70_v23 = vld [vmem:[#allocation5 + $0x70] sm:$0xff]  ;;  %v73_v24 = vld [vmem:[#allocation5 + $0x88] sm:$0xff] }
  0x3d   :  { %v75_v25 = vld [vmem:[#allocation5 + $0x98] sm:$0xff]  ;;  %v72_v26 = vld [vmem:[#allocation5 + $0x80] sm:$0xff]  ;;  %v74_v27 = vld [vmem:[#allocation5 + $0x90] sm:$0xff]  ;;  %v1208_v28 = vpack.c.bf16 %v70_v23, %v68_v22  ;;  %v1461_v5 = vsub.s32 0, %v92_v4  ;;  %v1463_v7 = vsub.s32 1, %v92_v4  ;;  %p1370_p13 = por %p1369_p12, %p1368_p11 }
  0x3e   :  { %v77_v29 = vld [vmem:[#allocation5 + $0xa8] sm:$0xff]  ;;  %v79_v30 = vld [vmem:[#allocation5 + $0xb8] sm:$0xff]  ;;  %v1210_v31 = vpack.c.bf16 %v75_v25, %v73_v24  ;;  %v76_v32 = vld [vmem:[#allocation5 + $0xa0] sm:$0xff]  ;;  %v1212_v34 = vpack.c.bf16 %v74_v27, %v72_v26 }
  0x3f   :  { %1201 = vmatpush1.bf16.msra.mxu0 %v1200_v14  ;;  %v78_v33 = vld [vmem:[#allocation5 + $0xb0] sm:$0xff]  ;;  %v81_v35 = vld [vmem:[#allocation5 + $0xc8] sm:$0xff]  ;;  %v83_v36 = vld [vmem:[#allocation5 + $0xd8] sm:$0xff]  ;;  %v1214_v37 = vpack.c.bf16 %v79_v30, %v77_v29  ;;  %p1371_p0 = pnand %p1370_p13, %p1364_p10 }
  0x40   :  { %1203 = vmatprep.subr.bf16.mxu0 %v1202_v15  ;;  %v80_v38 = vld [vmem:[#allocation5 + $0xc0] sm:$0xff]  ;;  %v82_v39 = vld [vmem:[#allocation5 + $0xd0] sm:$0xff]  ;;  %v1216_v40 = vpack.c.bf16 %v78_v33, %v76_v32  ;;  %v85_v41 = vld [vmem:[#allocation5 + $0xe8] sm:$0xff]  ;;  %v1218_v43 = vpack.c.bf16 %v83_v36, %v81_v35 }
  0x41   :  { %v87_v42 = vld [vmem:[#allocation5 + $0xf8] sm:$0xff]  ;;  %v84_v44 = vld [vmem:[#allocation5 + $0xe0] sm:$0xff]  ;;  %v86_v45 = vld [vmem:[#allocation5 + $0xf0] sm:$0xff]  ;;  %v1220_v46 = vpack.c.bf16 %v82_v39, %v80_v38 }
  0x42   :  { %v1222_v47 = vpack.c.bf16 %v87_v42, %v85_v41  ;;  %v1224_v48 = vpack.c.bf16 %v86_v45, %v84_v44  ;;  %v55_v49 = vld [vmem:[#allocation2] sm:$0xff]  ;;  %v1237_v50 = vld [vmem:[#allocation7 + $0x40] sm:$0xff]   ;;  %v1239_v52 = vld [vmem:[#allocation7 + $0x48] sm:$0xff]  }
  0x43   :  { %1205 = vmatpush1.bf16.msra.mxu0 %v1204_v20  ;;  %v1238_v51 = vld [vmem:[#allocation7] sm:$0xff]   ;;  %1056 = vmatprep.subr.bf16.mxu1 %v1237_v50  ;;  %v1240_v53 = vld [vmem:[#allocation7 + $0x8] sm:$0xff]   ;;  %v1241_v54 = vld [vmem:[#allocation7 + $0x50] sm:$0xff]  }
  0x44   :  { %1207 = vmatprep.subr.bf16.mxu0 %v1206_v21  ;;  %1057 = vmatpush3.bf16.msra.mxu1 %v1238_v51  ;;  %v1242_v55 = vld [vmem:[#allocation7 + $0x10] sm:$0xff]   ;;  %v1243_v56 = vld [vmem:[#allocation7 + $0x58] sm:$0xff]   ;;  %v1245_v58 = vld [vmem:[#allocation7 + $0x60] sm:$0xff]  }
  0x45   :  { %1058 = vmatprep.subr.bf16.mxu1 %v1239_v52  ;;  %v1244_v57 = vld [vmem:[#allocation7 + $0x18] sm:$0xff]   ;;  %v1246_v59 = vld [vmem:[#allocation7 + $0x20] sm:$0xff]   ;;  %v1247_v60 = vld [vmem:[#allocation7 + $0x68] sm:$0xff]  }
  0x46   :  { %v1248_v61 = vld [vmem:[#allocation7 + $0x28] sm:$0xff]   ;;  %v1249_v62 = vld [vmem:[#allocation7 + $0x70] sm:$0xff]   ;;  %v1251_v1 = vld [vmem:[#allocation7 + $0x78] sm:$0xff]  }
  0x47   :  { %1209 = vmatpush1.bf16.msra.mxu0 %v1208_v28  ;;  %v1250_v63 = vld [vmem:[#allocation7 + $0x30] sm:$0xff]   ;;  %v1252_v2 = vld [vmem:[#allocation7 + $0x38] sm:$0xff]   ;;  %v89_v6 = vld [vmem:[#allocation5 + $0x100] ss:$8 sm:$0x3] }
  0x48   :  { %1211 = vmatprep.subr.bf16.mxu0 %v1210_v31  ;;  %1059 = vmatpush3.bf16.msra.mxu1 %v1240_v53  ;;  %v94_v8 = vrot.slane %v89_v6, %v1461_v5  ;;  %v98_v9 = vrot.slane %v89_v6, %v1463_v7 }
  0x49   :  { %1060 = vmatprep.subr.bf16.mxu1 %v1241_v54  ;;  %v1399_v54 = vmov 1966171168  }
  0x4b   :  { %1213 = vmatpush1.bf16.msra.mxu0 %v1212_v34 }
  0x4c   :  { %1215 = vmatprep.subr.bf16.mxu0 %v1214_v37  ;;  %1061 = vmatpush3.bf16.msra.mxu1 %v1242_v55  ;;  %v222_v55 = vunpack.c.l.s4 %v1399_v54  ;;  %v317_v54 = vld [vmem:[#allocation5 + $0x104] ss:$0 sm:$0xff] }
  0x4d   :  { %1062 = vmatprep.subr.bf16.mxu1 %v1243_v56 }
  0x4e   :  { %v223_v56 = vunpack.c.0.s8 %v222_v55 }
  0x4f   :  { %1217 = vmatpush1.bf16.msra.mxu0 %v1216_v40 }
  0x50   :  { %1219 = vmatprep.subr.bf16.mxu0 %v1218_v43  ;;  %1063 = vmatpush3.bf16.msra.mxu1 %v1244_v57 }
  0x51   :  { %1064 = vmatprep.subr.bf16.mxu1 %v1245_v58  ;;  %v226_v58 = vsub.s32 %v223_v56, %v92_v4 }
  0x53   :  { %1221 = vmatpush1.bf16.msra.mxu0 %v1220_v46 }
  0x54   :  { %1223 = vmatprep.subr.bf16.mxu0 %v1222_v47  ;;  %1065 = vmatpush3.bf16.msra.mxu1 %v1246_v59 }
  0x55   :  { %1066 = vmatprep.subr.bf16.mxu1 %v1247_v60 }
  0x57   :  { %1225 = vmatpush1.bf16.msra.mxu0 %v1224_v48 }
  0x58   :  { %1114 = vmatprep.subr.bf16.mxu0 %v1398_v0  ;;  %1067 = vmatpush3.bf16.msra.mxu1 %v1248_v61 }
  0x59   :  { %1068 = vmatprep.subr.bf16.mxu1 %v1249_v62  ;;  %v173_v62 = vld [vmem:[#allocation5 + $0x101] ss:$8 sm:$0x3] }
  0x5a   :  { %166 = vmatmul.mubr.f32.vlgmr.msra.gmra.mrb[0].mxu0 %v55_v49 }
  0x5b   :  { %1130 = vmatprep.mubr.msk.bf16.mxu0 %vm1400_vm0, %v1398_v0 }
  0x5c   :  { %1069 = vmatpush3.bf16.msra.mxu1 %v1250_v63 }
  0x5d   :  { %1070 = vmatprep.subr.bf16.mxu1 %v1251_v1 }
  0x60   :  { %1071 = vmatpush3.bf16.msra.mxu1 %v1252_v2 }
  0x61   :  { %1134 = vmatprep.subr.bf16.mxu1 %v1398_v0 }
 0x12d   :  { %v167_v10 = vpop.f32.mrb[0].mxu0 }
 0x12e   :  { %v168_v11 = vadd.f32 %v167_v10, %v94_v8  ;;  %v169_v12 = vpop.f32.mrb[1].mxu0 }
 0x12f   :  { %v170_v13 = vadd.f32 %v169_v12, %v98_v9 }
 0x130   :  { %v176_v14 = vmax.f32 %v168_v11, 0.0 }
 0x131   :  { %v177_v15 = vmax.f32 %v170_v13, 0.0  ;;  %v175_v13 = vld [vmem:[#allocation5 + $0x102] ss:$8 sm:$0x3] }
 0x132   :  { %v178_v16 = vrot.slane %v176_v14, 4  ;;  %v190_v17 = vmul.f32 %v176_v14, %v176_v14 }
 0x133   :  { %v184_v18 = vrot.slane %v177_v15, 4  ;;  %v191_v19 = vmul.f32 %v177_v15, %v177_v15 }
 0x134   :  { %v179_v20 = vadd.f32 %v178_v16, %v176_v14  ;;  %v192_v21 = vrot.slane %v190_v17, 4 }
 0x135   :  { %v185_v22 = vadd.f32 %v184_v18, %v177_v15  ;;  %v198_v23 = vrot.slane %v191_v19, 4 }
 0x136   :  { %v180_v24 = vrot.slane %v179_v20, 2  ;;  %v193_v25 = vadd.f32 %v192_v21, %v190_v17 }
 0x137   :  { %v186_v26 = vrot.slane %v185_v22, 2  ;;  %v199_v27 = vadd.f32 %v198_v23, %v191_v19  ;;  %v1253_v23 = vld [vmem:[#allocation7 + $0x80] sm:$0xff]  }
 0x138   :  { %v181_v28 = vadd.f32 %v180_v24, %v179_v20  ;;  %v194_v29 = vrot.slane %v193_v25, 2  ;;  %1115 = vmatpush3.bf16.msra.mxu0 %v1253_v23  ;;  %v1258_v24 = vld [vmem:[#allocation7 + $0xa8] sm:$0xff]  }
 0x139   :  { %v200_v30 = vrot.slane %v199_v27, 2  ;;  %v187_v31 = vadd.f32 %v186_v26, %v185_v22  ;;  %1116 = vmatprep.subr.bf16.mxu0 %v1398_v0  ;;  %v1260_v26 = vld [vmem:[#allocation7 + $0xb8] sm:$0xff]  }
 0x13a   :  { %v182_v32 = vrot.slane %v181_v28, 1  ;;  %v195_v33 = vadd.f32 %v194_v29, %v193_v25  ;;  %v1259_v25 = vld [vmem:[#allocation7 + $0xb0] sm:$0xff]  }
 0x13b   :  { %v201_v34 = vadd.f32 %v200_v30, %v199_v27  ;;  %v188_v35 = vrot.slane %v187_v31, 1 }
 0x13c   :  { %v196_v36 = vrot.slane %v195_v33, 1  ;;  %v183_v37 = vadd.f32 %v182_v32, %v181_v28  ;;  %v316_v28 = vld [vmem:[#allocation5 + $0x103] ss:$0 sm:$0xff] }
 0x13d   :  { %v202_v38 = vrot.slane %v201_v34, 1  ;;  %v189_v39 = vadd.f32 %v188_v35, %v187_v31 }
 0x13e   :  { %v197_v40 = vadd.f32 %v196_v36, %v195_v33  ;;  %v204_v41 = vmul.f32 0.125, %v183_v37 }
 0x13f   :  { %v203_v42 = vadd.f32 %v202_v38, %v201_v34  ;;  %v205_v43 = vmul.f32 0.125, %v189_v39 }
 0x140   :  { %v206_v44 = vmul.f32 0.125, %v197_v40  ;;  %v208_v45 = vmul.f32 %v204_v41, %v204_v41 }
 0x141   :  { %v207_v46 = vmul.f32 0.125, %v203_v42  ;;  %v209_v47 = vmul.f32 %v205_v43, %v205_v43 }
 0x142   :  { %v210_v48 = vsub.f32 %v206_v44, %v208_v45 }
 0x143   :  { %v211_v49 = vsub.f32 %v207_v46, %v209_v47 }
 0x144   :  { %v212_v50 = vmax.f32 %v210_v48, 0.0 }
 0x145   :  { %v213_v51 = vmax.f32 %v211_v49, 0.0 }
 0x146   :  { %v214_v52 = vadd.f32 1e-05, %v212_v50 }
 0x147   :  { %v215_v53 = vadd.f32 1e-05, %v213_v51 }
 0x148   :  { %1285 = vrsqrt.f32 %v214_v52 }
 0x149   :  { %1287 = vrsqrt.f32 %v215_v53 }
 0x152   :  { %v1286_v57 = vpop.eup %1285 }
 0x153   :  { %v1288_v59 = vpop.eup %1287 }
 0x154   :  { %v220_v60 = vcombine.low %v1286_v57, %v1288_v59  ;;  %v318_v57 = vld [vmem:[#allocation5 + $0x105] ss:$0 sm:$0xff] }
 0x156   :  { %v227_v61 = vrot.slane %v220_v60, %v226_v58 }
 0x158   :  { %v234_v63 = vrot.slane %v227_v61, %v226_v58 }
 0x15a   :  { %v236_v1 = vmul.f32 %v234_v63, %v173_v62  ;;  %v1261_v63 = vld [vmem:[#allocation7 + $0xc0] sm:$0xff]  }
 0x15c   :  { %v241_v2 = vrot.slane %v236_v1, %v1461_v5  ;;  %v245_v3 = vrot.slane %v236_v1, %v1463_v7  ;;  %v1262_v1 = vld [vmem:[#allocation7 + $0xc8] sm:$0xff]  }
 0x15e   :  { %v248_v6 = vmul.f32 %v241_v2, %v204_v41  ;;  %v249_v8 = vmul.f32 %v245_v3, %v205_v43  ;;  %v270_v9 = vmul.f32 %v245_v3, %v177_v15  ;;  %v269_v10 = vmul.f32 %v241_v2, %v176_v14  ;;  %v1254_v14 = vld [vmem:[#allocation7 + $0x88] sm:$0xff]   ;;  %v1257_v15 = vld [vmem:[#allocation7 + $0xa0] sm:$0xff]   ;;  %v1263_v2 = vld [vmem:[#allocation7 + $0xd0] sm:$0xff]  }
 0x15f   :  { %1117 = vmatpush3.bf16.msra.mxu0 %v1254_v14  ;;  %v1264_v3 = vld [vmem:[#allocation7 + $0xd8] sm:$0xff]  }
 0x160   :  { %v252_v11 = vcombine.low %v248_v6, %v249_v8  ;;  %1118 = vmatprep.subr.bf16.mxu0 %v1398_v0  ;;  %v1265_v6 = vld [vmem:[#allocation7 + $0xe0] sm:$0xff]   ;;  %v1266_v8 = vld [vmem:[#allocation7 + $0xe8] sm:$0xff]  }
 0x162   :  { %v259_v12 = vrot.slane %v252_v11, %v226_v58  ;;  %v499_v11 = vld [vmem:[#allocation5 + $0x106] ss:$0 sm:$0xff] }
 0x164   :  { %v266_v16 = vrot.slane %v259_v12, %v226_v58 }
 0x166   :  { %v268_v17 = vsub.f32 %v175_v13, %v266_v16 }
 0x168   :  { %v279_v4 = vrot.slane %v268_v17, %v1463_v7  ;;  %v275_v18 = vrot.slane %v268_v17, %v1461_v5  ;;  %v1255_v5 = vld [vmem:[#allocation7 + $0x90] sm:$0xff]   ;;  %v1256_v7 = vld [vmem:[#allocation7 + $0x98] sm:$0xff]  }
 0x169   :  { %1119 = vmatpush3.bf16.msra.mxu0 %v1255_v5 }
 0x16a   :  { %v283_v19 = vadd.f32 %v279_v4, %v270_v9  ;;  %v282_v20 = vadd.f32 %v275_v18, %v269_v10  ;;  %1120 = vmatprep.subr.bf16.mxu0 %v1398_v0  ;;  %v1267_v9 = vld [vmem:[#allocation7 + $0xf0] sm:$0xff]   ;;  %v1268_v10 = vld [vmem:[#allocation7 + $0xf8] sm:$0xff]  }
 0x16c   :  { %v320_v21 = vpack.c.bf16 %v283_v19, %v283_v19  ;;  %v319_v22 = vpack.c.bf16 %v282_v20, %v282_v20 }
 0x16d   :  { %1121 = vmatpush3.bf16.msra.mxu0 %v1256_v7 }
 0x16e   :  { %449 = vmatprep.mubr.bf16.mxu1 %v320_v21  ;;  %1122 = vmatprep.subr.bf16.mxu0 %v1398_v0 }
 0x16f   :  { %450 = vmatmul.mubr.bf16.vlgmr.msra.gmra.mrb[0].mxu1 %v319_v22 }
 0x170   :  { %1150 = vmatprep.mubr.msk.bf16.mxu1 %vm1400_vm0, %v1398_v0  ;;  %1135 = vmatpush3.bf16.msra.mxu1 %v1261_v63 }
 0x171   :  { %1123 = vmatpush3.bf16.msra.mxu0 %v1257_v15  ;;  %1136 = vmatprep.subr.bf16.mxu1 %v1398_v0 }
 0x172   :  { %1124 = vmatprep.subr.bf16.mxu0 %v1398_v0 }
 0x174   :  { %1137 = vmatpush3.bf16.msra.mxu1 %v1262_v1 }
 0x175   :  { %1125 = vmatpush3.bf16.msra.mxu0 %v1258_v24  ;;  %1138 = vmatprep.subr.bf16.mxu1 %v1398_v0 }
 0x176   :  { %1126 = vmatprep.subr.bf16.mxu0 %v1398_v0 }
 0x178   :  { %1139 = vmatpush3.bf16.msra.mxu1 %v1263_v2 }
 0x179   :  { %1127 = vmatpush3.bf16.msra.mxu0 %v1259_v25  ;;  %1140 = vmatprep.subr.bf16.mxu1 %v1398_v0 }
 0x17a   :  { %1128 = vmatprep.subr.bf16.mxu0 %v1398_v0 }
 0x17c   :  { %1141 = vmatpush3.bf16.msra.mxu1 %v1264_v3 }
 0x17d   :  { %1129 = vmatpush3.bf16.msra.mxu0 %v1260_v26  ;;  %1142 = vmatprep.subr.bf16.mxu1 %v1398_v0 }
 0x17e   :  { %1154 = vmatprep.subr.bf16.mxu0 %v1398_v0 }
 0x180   :  { %1143 = vmatpush3.bf16.msra.mxu1 %v1265_v6 }
 0x181   :  { %1144 = vmatprep.subr.bf16.mxu1 %v1398_v0 }
 0x184   :  { %1145 = vmatpush3.bf16.msra.mxu1 %v1266_v8 }
 0x185   :  { %1146 = vmatprep.subr.bf16.mxu1 %v1398_v0 }
 0x188   :  { %1147 = vmatpush3.bf16.msra.mxu1 %v1267_v9 }
 0x189   :  { %1148 = vmatprep.subr.bf16.mxu1 %v1398_v0 }
 0x18c   :  { %1149 = vmatpush3.bf16.msra.mxu1 %v1268_v10 }
 0x18d   :  { %1174 = vmatprep.subr.bf16.mxu1 %v1398_v0 }
 0x242   :  { %v1072_v27 = vpop.f32.mrb[0].mxu1 }
 0x243   :  { %v1073_v29 = vpop.f32.mrb[1].mxu1 }
 0x244   :  { %v1074_v30 = vadd.f32 %v1073_v29, %v1072_v27  ;;  %v1075_v31 = vpop.f32.mrb[2].mxu1 }
 0x245   :  { %v1076_v32 = vpop.f32.mrb[3].mxu1 }
 0x246   :  { %v452_v33 = vadd.f32 %v1074_v30, %v316_v28 }
 0x248   :  { %v457_v34 = vmax.f32 %v452_v33, 0.0 }
 0x24a   :  { %v458_v35 = vrot.slane %v457_v34, 4  ;;  %v464_v36 = vmul.f32 %v457_v34, %v457_v34 }
 0x24c   :  { %v459_v37 = vadd.f32 %v458_v35, %v457_v34  ;;  %v465_v38 = vrot.slane %v464_v36, 4 }
 0x24e   :  { %v460_v39 = vrot.slane %v459_v37, 2  ;;  %v466_v40 = vadd.f32 %v465_v38, %v464_v36 }
 0x250   :  { %v461_v41 = vadd.f32 %v460_v39, %v459_v37  ;;  %v467_v42 = vrot.slane %v466_v40, 2  ;;  %v501_v37 = vld [vmem:[#allocation5 + $0x110] ss:$0 sm:$0xff] }
 0x252   :  { %v462_v43 = vrot.slane %v461_v41, 1  ;;  %v468_v44 = vadd.f32 %v467_v42, %v466_v40 }
 0x254   :  { %v469_v45 = vrot.slane %v468_v44, 1  ;;  %v463_v46 = vadd.f32 %v462_v43, %v461_v41  ;;  %v1269_v43 = vld [vmem:[#allocation7 + $0x100] sm:$0xff]  }
 0x256   :  { %v470_v47 = vadd.f32 %v469_v45, %v468_v44  ;;  %v471_v48 = vmul.f32 0.125, %v463_v46  ;;  %v1270_v44 = vld [vmem:[#allocation7 + $0x108] sm:$0xff]   ;;  %v1271_v45 = vld [vmem:[#allocation7 + $0x110] sm:$0xff]   ;;  %v1272_v46 = vld [vmem:[#allocation7 + $0x118] sm:$0xff]  }
 0x258   :  { %v472_v49 = vmul.f32 0.125, %v470_v47  ;;  %v473_v50 = vmul.f32 %v471_v48, %v471_v48  ;;  %v1273_v47 = vld [vmem:[#allocation7 + $0x120] sm:$0xff]  }
 0x25a   :  { %v474_v51 = vsub.f32 %v472_v49, %v473_v50  ;;  %v1275_v49 = vld [vmem:[#allocation7 + $0x130] sm:$0xff]   ;;  %v1276_v50 = vld [vmem:[#allocation7 + $0x138] sm:$0xff]  }
 0x25c   :  { %v475_v52 = vmax.f32 %v474_v51, 0.0  ;;  %v633_v51 = vld [vmem:[#allocation5 + $0x111] ss:$0 sm:$0xff] }
 0x25e   :  { %v476_v53 = vadd.f32 1e-05, %v475_v52 }
 0x260   :  { %1289 = vrsqrt.f32 %v476_v53 }
 0x26a   :  { %v1290_v55 = vpop.eup %1289 }
 0x26b   :  { %v478_v56 = vmul.f32 %v1290_v55, %v317_v54 }
 0x26d   :  { %v479_v58 = vmul.f32 %v478_v56, %v471_v48  ;;  %v481_v60 = vmul.f32 %v478_v56, %v457_v34  ;;  %v500_v34 = vld [vmem:[#allocation5 + $0x107] ss:$0 sm:$0xff]  ;;  %v1274_v48 = vld [vmem:[#allocation7 + $0x128] sm:$0xff]  }
 0x26f   :  { %v480_v59 = vsub.f32 %v318_v57, %v479_v58 }
 0x271   :  { %v482_v61 = vadd.f32 %v481_v60, %v480_v59 }
 0x273   :  { %v502_v62 = vpack.c.bf16 %v482_v61, %v482_v61 }
 0x275   :  { %1131 = vmatmul.mubr.bf16.vlgmr.msra.gmra.mrb[4].mxu0 %v502_v62 }
 0x276   :  { %1170 = vmatprep.mubr.msk.bf16.mxu0 %vm1400_vm0, %v1398_v0  ;;  %1155 = vmatpush3.bf16.msra.mxu0 %v1269_v43 }
 0x277   :  { %1156 = vmatprep.subr.bf16.mxu0 %v1398_v0 }
 0x27a   :  { %1157 = vmatpush3.bf16.msra.mxu0 %v1270_v44 }
 0x27b   :  { %1158 = vmatprep.subr.bf16.mxu0 %v1398_v0 }
 0x27e   :  { %1159 = vmatpush3.bf16.msra.mxu0 %v1271_v45 }
 0x27f   :  { %1160 = vmatprep.subr.bf16.mxu0 %v1398_v0 }
 0x282   :  { %1161 = vmatpush3.bf16.msra.mxu0 %v1272_v46 }
 0x283   :  { %1162 = vmatprep.subr.bf16.mxu0 %v1398_v0 }
 0x286   :  { %1163 = vmatpush3.bf16.msra.mxu0 %v1273_v47 }
 0x287   :  { %1164 = vmatprep.subr.bf16.mxu0 %v1398_v0 }
 0x28a   :  { %1165 = vmatpush3.bf16.msra.mxu0 %v1274_v48 }
 0x28b   :  { %1166 = vmatprep.subr.bf16.mxu0 %v1398_v0 }
 0x28e   :  { %1167 = vmatpush3.bf16.msra.mxu0 %v1275_v49 }
 0x28f   :  { %1168 = vmatprep.subr.bf16.mxu0 %v1398_v0 }
 0x292   :  { %1169 = vmatpush3.bf16.msra.mxu0 %v1276_v50 }
 0x348   :  { %v585_v12 = vpop.f32.mrb[4].mxu0 }
 0x349   :  { %v586_v13 = vadd.f32 %v585_v12, %v499_v11  ;;  %v1132_v16 = vpop.f32.mrb[5].mxu0 }
 0x34a   :  { %v588_v17 = vpop.f32.mrb[6].mxu0 }
 0x34b   :  { %v591_v4 = vmax.f32 %v586_v13, 0.0  ;;  %v1133_v18 = vpop.f32.mrb[7].mxu0 }
 0x34c   :  { %v634_v18 = vld [vmem:[#allocation5 + $0x112] ss:$0 sm:$0xff] }
 0x34d   :  { %v592_v19 = vrot.slane %v591_v4, 4  ;;  %v598_v20 = vmul.f32 %v591_v4, %v591_v4 }
 0x34f   :  { %v593_v21 = vadd.f32 %v592_v19, %v591_v4  ;;  %v599_v22 = vrot.slane %v598_v20, 4 }
 0x351   :  { %v594_v23 = vrot.slane %v593_v21, 2  ;;  %v600_v14 = vadd.f32 %v599_v22, %v598_v20 }
 0x353   :  { %v595_v5 = vadd.f32 %v594_v23, %v593_v21  ;;  %v601_v7 = vrot.slane %v600_v14, 2  ;;  %v635_v21 = vld [vmem:[#allocation5 + $0x113] ss:$0 sm:$0xff] }
 0x355   :  { %v596_v15 = vrot.slane %v595_v5, 1  ;;  %v602_v24 = vadd.f32 %v601_v7, %v600_v14 }
 0x357   :  { %v597_v25 = vadd.f32 %v596_v15, %v595_v5  ;;  %v603_v26 = vrot.slane %v602_v24, 1  ;;  %v1277_v15 = vld [vmem:[#allocation7 + $0x140] sm:$0xff]  }
 0x359   :  { %v604_v27 = vadd.f32 %v603_v26, %v602_v24  ;;  %v605_v28 = vmul.f32 0.125, %v597_v25  ;;  %v1278_v24 = vld [vmem:[#allocation7 + $0x148] sm:$0xff]   ;;  %v1279_v25 = vld [vmem:[#allocation7 + $0x150] sm:$0xff]   ;;  %v1280_v26 = vld [vmem:[#allocation7 + $0x158] sm:$0xff]  }
 0x35b   :  { %v606_v29 = vmul.f32 0.125, %v604_v27  ;;  %v607_v30 = vmul.f32 %v605_v28, %v605_v28  ;;  %v1281_v27 = vld [vmem:[#allocation7 + $0x160] sm:$0xff]  }
 0x35d   :  { %v608_v31 = vsub.f32 %v606_v29, %v607_v30  ;;  %v1283_v29 = vld [vmem:[#allocation7 + $0x170] sm:$0xff]   ;;  %v1284_v30 = vld [vmem:[#allocation7 + $0x178] sm:$0xff]  }
 0x35f   :  { %v609_v32 = vmax.f32 %v608_v31, 0.0  ;;  %v767_v31 = vld [vmem:[#allocation5 + $0x114] ss:$0 sm:$0xff] }
 0x361   :  { %v610_v33 = vadd.f32 1e-05, %v609_v32 }
 0x363   :  { %1291 = vrsqrt.f32 %v610_v33 }
 0x36d   :  { %v1292_v35 = vpop.eup %1291 }
 0x36e   :  { %v612_v36 = vmul.f32 %v1292_v35, %v500_v34 }
 0x370   :  { %v613_v38 = vmul.f32 %v612_v36, %v605_v28  ;;  %v615_v39 = vmul.f32 %v612_v36, %v591_v4  ;;  %v1282_v28 = vld [vmem:[#allocation7 + $0x168] sm:$0xff]  }
 0x372   :  { %v614_v40 = vsub.f32 %v501_v37, %v613_v38 }
 0x374   :  { %v616_v41 = vadd.f32 %v615_v39, %v614_v40 }
 0x376   :  { %v636_v42 = vpack.c.bf16 %v616_v41, %v616_v41 }
 0x378   :  { %1151 = vmatmul.mubr.bf16.vlgmr.msra.gmra.mrb[4].mxu1 %v636_v42 }
 0x379   :  { %1190 = vmatprep.mubr.msk.bf16.mxu1 %vm1400_vm0, %v1398_v0  ;;  %1175 = vmatpush3.bf16.msra.mxu1 %v1277_v15 }
 0x37a   :  { %1176 = vmatprep.subr.bf16.mxu1 %v1398_v0 }
 0x37d   :  { %1177 = vmatpush3.bf16.msra.mxu1 %v1278_v24 }
 0x37e   :  { %1178 = vmatprep.subr.bf16.mxu1 %v1398_v0 }
 0x381   :  { %1179 = vmatpush3.bf16.msra.mxu1 %v1279_v25 }
 0x382   :  { %1180 = vmatprep.subr.bf16.mxu1 %v1398_v0 }
 0x385   :  { %1181 = vmatpush3.bf16.msra.mxu1 %v1280_v26 }
 0x386   :  { %1182 = vmatprep.subr.bf16.mxu1 %v1398_v0 }
 0x389   :  { %1183 = vmatpush3.bf16.msra.mxu1 %v1281_v27 }
 0x38a   :  { %1184 = vmatprep.subr.bf16.mxu1 %v1398_v0 }
 0x38d   :  { %1185 = vmatpush3.bf16.msra.mxu1 %v1282_v28 }
 0x38e   :  { %1186 = vmatprep.subr.bf16.mxu1 %v1398_v0 }
 0x391   :  { %1187 = vmatpush3.bf16.msra.mxu1 %v1283_v29 }
 0x392   :  { %1188 = vmatprep.subr.bf16.mxu1 %v1398_v0 }
 0x395   :  { %1189 = vmatpush3.bf16.msra.mxu1 %v1284_v30 }
 0x44b   :  { %v719_v52 = vpop.f32.mrb[4].mxu1 }
 0x44c   :  { %v720_v53 = vadd.f32 %v719_v52, %v633_v51  ;;  %v1152_v54 = vpop.f32.mrb[5].mxu1 }
 0x44d   :  { %v722_v55 = vpop.f32.mrb[6].mxu1 }
 0x44e   :  { %v725_v56 = vmax.f32 %v720_v53, 0.0  ;;  %v1153_v57 = vpop.f32.mrb[7].mxu1 }
 0x450   :  { %v726_v58 = vrot.slane %v725_v56, 4  ;;  %v732_v59 = vmul.f32 %v725_v56, %v725_v56 }
 0x452   :  { %v727_v60 = vadd.f32 %v726_v58, %v725_v56  ;;  %v733_v61 = vrot.slane %v732_v59, 4 }
 0x454   :  { %v728_v62 = vrot.slane %v727_v60, 2  ;;  %v734_v63 = vadd.f32 %v733_v61, %v732_v59  ;;  %v769_v59 = vld [vmem:[#allocation5 + $0x116] ss:$0 sm:$0xff] }
 0x456   :  { %v729_v1 = vadd.f32 %v728_v62, %v727_v60  ;;  %v735_v2 = vrot.slane %v734_v63, 2 }
 0x458   :  { %v730_v3 = vrot.slane %v729_v1, 1  ;;  %v736_v6 = vadd.f32 %v735_v2, %v734_v63  ;;  %v901_v2 = vld [vmem:[#allocation5 + $0x117] ss:$0 sm:$0xff] }
 0x45a   :  { %v731_v8 = vadd.f32 %v730_v3, %v729_v1  ;;  %v737_v9 = vrot.slane %v736_v6, 1 }
 0x45c   :  { %v738_v10 = vadd.f32 %v737_v9, %v736_v6  ;;  %v739_v11 = vmul.f32 0.125, %v731_v8 }
 0x45e   :  { %v740_v12 = vmul.f32 0.125, %v738_v10  ;;  %v741_v13 = vmul.f32 %v739_v11, %v739_v11 }
 0x460   :  { %v742_v16 = vsub.f32 %v740_v12, %v741_v13 }
 0x462   :  { %v743_v17 = vmax.f32 %v742_v16, 0.0 }
 0x464   :  { %v744_v4 = vadd.f32 1e-05, %v743_v17 }
 0x466   :  { %1293 = vrsqrt.f32 %v744_v4 }
 0x470   :  { %v1294_v19 = vpop.eup %1293 }
 0x471   :  { %v746_v20 = vmul.f32 %v1294_v19, %v634_v18 }
 0x473   :  { %v747_v22 = vmul.f32 %v746_v20, %v739_v11  ;;  %v749_v23 = vmul.f32 %v746_v20, %v725_v56  ;;  %v768_v56 = vld [vmem:[#allocation5 + $0x115] ss:$0 sm:$0xff] }
 0x475   :  { %v748_v14 = vsub.f32 %v635_v21, %v747_v22 }
 0x477   :  { %v750_v5 = vadd.f32 %v749_v23, %v748_v14 }
 0x479   :  { %v770_v7 = vpack.c.bf16 %v750_v5, %v750_v5 }
 0x47b   :  { %1171 = vmatmul.mubr.bf16.vlgmr.msra.gmra.mrb[8].mxu0 %v770_v7 }
 0x54e   :  { %v853_v32 = vpop.f32.mrb[8].mxu0 }
 0x54f   :  { %v854_v33 = vadd.f32 %v853_v32, %v767_v31  ;;  %v1172_v34 = vpop.f32.mrb[9].mxu0 }
 0x550   :  { %v856_v35 = vpop.f32.mrb[10].mxu0 }
 0x551   :  { %v859_v36 = vmax.f32 %v854_v33, 0.0  ;;  %v1173_v37 = vpop.f32.mrb[11].mxu0 }
 0x553   :  { %v860_v38 = vrot.slane %v859_v36, 4  ;;  %v866_v39 = vmul.f32 %v859_v36, %v859_v36 }
 0x555   :  { %v861_v40 = vadd.f32 %v860_v38, %v859_v36  ;;  %v867_v41 = vrot.slane %v866_v39, 4 }
 0x557   :  { %v862_v42 = vrot.slane %v861_v40, 2  ;;  %v868_v43 = vadd.f32 %v867_v41, %v866_v39 }
 0x559   :  { %v863_v44 = vadd.f32 %v862_v42, %v861_v40  ;;  %v869_v45 = vrot.slane %v868_v43, 2 }
 0x55b   :  { %v864_v46 = vrot.slane %v863_v44, 1  ;;  %v870_v47 = vadd.f32 %v869_v45, %v868_v43 }
 0x55d   :  { %v865_v48 = vadd.f32 %v864_v46, %v863_v44  ;;  %v871_v0 = vrot.slane %v870_v47, 1 }
 0x55f   :  { %v872_v49 = vadd.f32 %v871_v0, %v870_v47  ;;  %v873_v50 = vmul.f32 0.125, %v865_v48 }
 0x561   :  { %v874_v51 = vmul.f32 0.125, %v872_v49  ;;  %v875_v52 = vmul.f32 %v873_v50, %v873_v50 }
 0x563   :  { %v876_v53 = vsub.f32 %v874_v51, %v875_v52 }
 0x565   :  { %v877_v54 = vmax.f32 %v876_v53, 0.0 }
 0x567   :  { %v878_v55 = vadd.f32 1e-05, %v877_v54 }
 0x569   :  { %1295 = vrsqrt.f32 %v878_v55 }
 0x573   :  { %v1296_v57 = vpop.eup %1295 }
 0x574   :  { %v880_v58 = vmul.f32 %v1296_v57, %v768_v56 }
 0x576   :  { %v881_v60 = vmul.f32 %v880_v58, %v873_v50  ;;  %v883_v61 = vmul.f32 %v880_v58, %v859_v36 }
 0x578   :  { %v882_v62 = vsub.f32 %v769_v59, %v881_v60 }
 0x57a   :  { %v884_v63 = vadd.f32 %v883_v61, %v882_v62 }
 0x57c   :  { %v902_v1 = vpack.c.bf16 %v884_v63, %v884_v63 }
 0x57e   :  { %1191 = vmatmul.mubr.bf16.vlgmr.msra.gmra.mrb[8].mxu1 %v902_v1 }
 0x651   :  { %v985_v3 = vpop.f32.mrb[8].mxu1 }
 0x652   :  { %v986_v6 = vadd.f32 %v985_v3, %v901_v2  ;;  %v1192_v8 = vpop.f32.mrb[9].mxu1 }
 0x653   :  { %v988_v9 = vpop.f32.mrb[10].mxu1 }
 0x654   :  { %991 = vst [vmem:[#allocation8] sm:$0xff] %v986_v6  ;;  %v1193_v10 = vpop.f32.mrb[11].mxu1 }
 0x655   :  { %1374 = shalt.err (!%p1371_p0)
}
 0x656   :  { %s1375_s27 = scalar_lea.hbm %s1524_s3, 128 }
 0x657   :  { %p1376_p1 = scmp.ne.s32.totalorder %s1524_s3, %s1375_s27  ;;  %p1379_p2 = scmp.lt.u32.totalorder %s1375_s27, %s1524_s3 }
 0x659   :  { %p1381_p3 = pnand %p1379_p2, %p1376_p1 }
 0x65b   :  { %1384 = shalt.err (!%p1381_p3)
}
 0x65c   :  { %1001 = dma.vmem_to_hbm [thread:$0]  %s999_s23, 128, %s1524_s3, [#allocation4]  }
 0x65d   :  { %1389 = dma.done.wait [#allocation4], 128  }
 0x65e   :  { %1390 = vsyncadd [#allocation4], 4294967168 }
 0x65f   :  { %1005 = vsyncpa [#allocation3], 1 }
 0x660   :  { %1006 = vsyncpa [#allocation6], 1 }
 0x661   :  { %1007 = vsyncpa [#allocation4], 1 }

</bundles_post_ra>
